<compile_context>
chip_gen: v5e
topology: v5e:2x2
jax: 0.10.0
libtpu: 0.0.40
codegen_flags: <defaults>
</compile_context>

<pallas_src>
import functools

import jax
import jax.numpy as jnp
import numpy as np
from jax import lax
from jax.experimental import pallas as pl
from jax.experimental.pallas import tpu as pltpu


def _ls_ce_kernel(logits_ref, target_ref, out_ref, *, ignore_index, n_rows,
                  vocab):
    x_raw = logits_ref[...]                               # (tm, V) input dtype
    t = target_ref[...]                                   # (tm, 1) int32
    tm = x_raw.shape[0]

    # Tail-row mask: the grid overruns the true row count on the last block.
    row_idx = (pl.program_id(0) * tm
               + lax.broadcasted_iota(jnp.int32, (tm, 1), 0))
    row_ok = row_idx < n_rows                             # (tm, 1) bool

    # max and the one-hot gather-select commute with the f32 cast, so do them
    # on the raw tile (halves vreg traffic on the bf16 ingest path).
    m = jnp.max(x_raw, axis=-1, keepdims=True).astype(jnp.float32)   # (tm, 1)
    col = lax.broadcasted_iota(jnp.int32, (1, vocab), 1)              # (1, V)
    onehot = col == t                                                 # (tm, V)
    zero = jnp.array(0, dtype=x_raw.dtype)
    x_at_t = jnp.sum(jnp.where(onehot, x_raw, zero),
                     axis=-1, keepdims=True).astype(jnp.float32)      # exact

    # f32 passes: stable logsumexp over the vocab (lane) axis + plain row sum.
    x = x_raw.astype(jnp.float32)
    lse = jnp.log(jnp.sum(jnp.exp(x - m), axis=-1, keepdims=True)) + m
    sum_x = jnp.sum(x, axis=-1, keepdims=True)

    nll = lse - x_at_t                                    # == -lprobs[target]
    smooth = float(vocab) * lse - sum_x                   # == -sum(lprobs)

    keep = row_ok
    if ignore_index is not None:
        keep = jnp.logical_and(keep, t != ignore_index)
    # select, never multiply: garbage tail logits may carry Inf/NaN.
    nll = jnp.where(keep, nll, 0.0)
    smooth = jnp.where(keep, smooth, 0.0)
    valid = jnp.sum(jnp.where(keep, 1.0, 0.0))

    nll_sum = jnp.sum(nll)
    smooth_sum = jnp.sum(smooth)

    # per-block partials: lane 0 = nll, lane 1 = smooth, lane 2 = n_valid.
    lane = lax.broadcasted_iota(jnp.int32, out_ref.shape, out_ref.ndim - 1)
    out_ref[...] = (jnp.where(lane == 0, nll_sum, 0.0)
                    + jnp.where(lane == 1, smooth_sum, 0.0)
                    + jnp.where(lane == 2, valid, 0.0))


def _vmem_params():
    """Generation-aware (budget, limit): v5e/v6e have 128 MiB VMEM, v7x has
    64 MiB per TensorCore; don't let a raised v6e default leak onto v7x."""
    try:
        cap = pltpu.get_tpu_info().vmem_capacity_bytes
    except Exception:
        cap = 64 * 1024 * 1024                    # conservative fallback
    if cap >= 100 * 1024 * 1024:                  # v5e / v6e (128 MiB)
        return 48 * 1024 * 1024, 96 * 1024 * 1024
    return 28 * 1024 * 1024, 48 * 1024 * 1024     # v7x (64 MiB per TC)


def _pick_block_rows(n_rows, vocab, itemsize, vmem_budget_bytes):
    """Largest row tile whose double-buffered input + f32 temporaries fit the
    (generation-aware) VMEM budget, with 25% headroom for Mosaic scratch."""
    # 2x double-buffered input tile + f32 upcast tile + exp tile + select temp
    per_row = int(vocab * (2 * itemsize + 16) * 1.25)
    br = vmem_budget_bytes // max(per_row, 1)
    quantum = 16 if itemsize < 4 else 8           # bf16 sublane packing
    br = max(quantum, (br // quantum) * quantum)
    br = min(br, 1024)
    n_padded = ((n_rows + quantum - 1) // quantum) * quantum
    return max(min(br, n_padded), quantum)


def label_smoothed_ce(logits, target, *, smoothing, ignore_index=None,
                      reduce=True, block_rows=None):
    """Forward pass of LabelSmoothedCrossEntropyCriterion (reduce=True)."""
    # TODO(synk): reduce=False (per-position losses) path not implemented.
    # TODO(synk): for V >= ~128K on v7x, add an inner "arbitrary" vocab axis
    #             with an online logsumexp carried in VMEM scratch so
    #             block_rows decouples from V (64 MiB per-TC VMEM).
    assert reduce, "only reduce=True is implemented"
    assert logits.ndim == 2 and target.ndim == 1

    N, V = logits.shape
    itemsize = jnp.dtype(logits.dtype).itemsize
    vmem_budget, vmem_limit = _vmem_params()

    if block_rows is None:
        block_rows = _pick_block_rows(N, V, itemsize, vmem_budget)

    num_blocks = -(-N // block_rows)              # ceil-div; tail masked in-kernel
    target2d = target.astype(jnp.int32).reshape(N, 1)

    cost = pl.CostEstimate(
        flops=int(5 * N * V),
        transcendentals=int(N * V),
        bytes_accessed=int(N * V * itemsize + N * 4
                           + num_blocks * 8 * 128 * 4),
    )

    partials = pl.pallas_call(
        functools.partial(_ls_ce_kernel, ignore_index=ignore_index,
                          n_rows=N, vocab=V),
        out_shape=jax.ShapeDtypeStruct((num_blocks, 8, 128), jnp.float32),
        grid_spec=pltpu.PrefetchScalarGridSpec(
            num_scalar_prefetch=0,
            grid=(num_blocks,),
            in_specs=[
                pl.BlockSpec((block_rows, V), lambda i: (i, 0)),
                pl.BlockSpec((block_rows, 1), lambda i: (i, 0)),
            ],
            out_specs=pl.BlockSpec((1, 8, 128), lambda i: (i, 0, 0)),
        ),
        compiler_params=pltpu.CompilerParams(
            dimension_semantics=("parallel",),
            vmem_limit_bytes=vmem_limit,
        ),
        cost_estimate=cost,
    )(logits, target2d)

    nll_sum = jnp.sum(partials[:, 0, 0])
    smooth_sum = jnp.sum(partials[:, 0, 1])
    valid_sum = jnp.sum(partials[:, 0, 2])

    if ignore_index is not None:
        n_valid = jnp.maximum(valid_sum, 1.0)
    else:
        n_valid = jnp.asarray(float(N), jnp.float32)

    nll_loss = nll_sum / n_valid
    smooth_loss = smooth_sum / n_valid
    eps_i = smoothing / V
    return (1.0 - smoothing) * nll_loss + eps_i * smooth_loss


def _reference_loss(logits, target, smoothing, ignore_index):
    """Pure-JAX reference mirroring the PyTorch forward (reduce=True)."""
    lprobs = jax.nn.log_softmax(logits.astype(jnp.float32), axis=-1)
    t = target[:, None]
    nll = -jnp.take_along_axis(lprobs, t, axis=-1)
    smooth = -jnp.sum(lprobs, axis=-1, keepdims=True)
    if ignore_index is not None:
        padm = t == ignore_index
        nll = jnp.where(padm, 0.0, nll)
        smooth = jnp.where(padm, 0.0, smooth)
        n_valid = jnp.maximum(jnp.sum(jnp.logical_not(padm)),
                              1).astype(jnp.float32)
    else:
        n_valid = jnp.asarray(float(logits.shape[0]), jnp.float32)
    nll_l = jnp.sum(nll) / n_valid
    smooth_l = jnp.sum(smooth) / n_valid
    eps_i = smoothing / logits.shape[-1]
    return (1.0 - smoothing) * nll_l + eps_i * smooth_l


if __name__ == "__main__":
    # small shapes: batch=4, seq=8 -> N=32 tokens, vocab=512
    N, V = 32, 512
    smoothing = 0.1
    ignore_index = 1  # pad token id

    key = jax.random.PRNGKey(0)
    k_logits, k_tgt = jax.random.split(key)
    logits = jax.random.normal(k_logits, (N, V), dtype=jnp.float32)
    target = jax.random.randint(k_tgt, (N,), 0, V, dtype=jnp.int32)
    # force a few padding positions to exercise the ignore_index mask
    target = target.at[-5:].set(ignore_index)

    loss = jax.block_until_ready(
        label_smoothed_ce(logits, target, smoothing=smoothing,
                          ignore_index=ignore_index, reduce=True))
    ref = jax.block_until_ready(
        _reference_loss(logits, target, smoothing, ignore_index))
    np.testing.assert_allclose(np.asarray(loss), np.asarray(ref),
                               rtol=1e-5, atol=1e-5)

    # bf16 ingestion path (halves HBM traffic); math is still f32 inside.
    logits_bf16 = logits.astype(jnp.bfloat16)
    loss_bf = jax.block_until_ready(
        label_smoothed_ce(logits_bf16, target, smoothing=smoothing,
                          ignore_index=ignore_index, reduce=True))
    ref_bf = jax.block_until_ready(
        _reference_loss(logits_bf16, target, smoothing, ignore_index))
    np.testing.assert_allclose(np.asarray(loss_bf), np.asarray(ref_bf),
                               rtol=1e-3, atol=1e-3)

    # in-kernel tail masking path: N not a multiple of block_rows, no
    # ignore_index (previously required padding / block shrinking).
    N2 = 24
    logits2 = jax.random.normal(jax.random.PRNGKey(2), (N2, V),
                                dtype=jnp.float32)
    target2 = jax.random.randint(jax.random.PRNGKey(3), (N2,), 0, V,
                                 dtype=jnp.int32)
    loss2 = jax.block_until_ready(
        label_smoothed_ce(logits2, target2, smoothing=smoothing,
                          ignore_index=None, reduce=True, block_rows=16))
    ref2 = jax.block_until_ready(
        _reference_loss(logits2, target2, smoothing, None))
    np.testing.assert_allclose(np.asarray(loss2), np.asarray(ref2),
                               rtol=1e-5, atol=1e-5)

    print("KERNEL_OK")
</pallas_src>

<mosaic_0001>
module attributes {stable_mosaic.version = 11 : i64} {
  func.func @_ls_ce_kernel(%arg0: i32, %arg1: memref<32x512xf32, #tpu.memory_space<vmem>>, %arg2: memref<32x1xi32, #tpu.memory_space<vmem>>, %arg3: memref<1x8x128xf32, #tpu.memory_space<vmem>>) attributes {dimension_semantics = [#tpu.dimension_semantics<parallel>], iteration_bounds = array<i64: 1>, scalar_prefetch = 0 : i64, scratch_operands = 0 : i64, tpu.core_type = #tpu.core_type<tc>, window_params = [{transform_indices = @transform_0, window_bounds = array<i64: 32, 512>}, {transform_indices = @transform_1, window_bounds = array<i64: 32, 1>}, {transform_indices = @transform_2, window_bounds = array<i64: 1, 8, 128>}]} {
    %c0 = arith.constant 0 : index
    %c0_0 = arith.constant 0 : index
    %0 = vector.load %arg1[%c0, %c0_0] : memref<32x512xf32, #tpu.memory_space<vmem>>, vector<32x512xf32>
    %c0_1 = arith.constant 0 : index
    %c0_2 = arith.constant 0 : index
    %1 = vector.load %arg2[%c0_1, %c0_2] : memref<32x1xi32, #tpu.memory_space<vmem>>, vector<32x1xi32>
    %c32_i32 = arith.constant 32 : i32
    %2 = arith.muli %arg0, %c32_i32 : i32
    %3 = tpu.iota {dimensions = array<i32: 0>} : vector<32x1xi32>
    %4 = vector.broadcast %2 : i32 to vector<32x1xi32>
    %5 = arith.addi %4, %3 : vector<32x1xi32>
    %c32_i32_3 = arith.constant 32 : i32
    %6 = vector.broadcast %c32_i32_3 : i32 to vector<32x1xi32>
    %7 = arith.cmpi slt, %5, %6 : vector<32x1xi32>
    %cst = arith.constant dense<0xFF800000> : vector<32xf32>
    %8 = vector.multi_reduction <maximumf>, %0, %cst [1] : vector<32x512xf32> to vector<32xf32>
    %9 = vector.shape_cast %8 : vector<32xf32> to vector<32x1xf32>
    %10 = tpu.iota {dimensions = array<i32: 1>} : vector<1x512xi32>
    %11 = vector.broadcast %10 : vector<1x512xi32> to vector<32x512xi32>
    %12 = vector.broadcast %1 : vector<32x1xi32> to vector<32x512xi32>
    %13 = arith.cmpi eq, %11, %12 : vector<32x512xi32>
    %cst_4 = arith.constant 0.000000e+00 : f32
    %14 = vector.broadcast %cst_4 : f32 to vector<32x512xf32>
    %15 = arith.select %13, %0, %14 : vector<32x512xi1>, vector<32x512xf32>
    %cst_5 = arith.constant dense<0.000000e+00> : vector<32xf32>
    %16 = vector.multi_reduction <add>, %15, %cst_5 [1] : vector<32x512xf32> to vector<32xf32>
    %17 = vector.shape_cast %16 : vector<32xf32> to vector<32x1xf32>
    %18 = vector.broadcast %9 : vector<32x1xf32> to vector<32x512xf32>
    %19 = arith.subf %0, %18 : vector<32x512xf32>
    %20 = math.exp %19 : vector<32x512xf32>
    %cst_6 = arith.constant dense<0.000000e+00> : vector<32xf32>
    %21 = vector.multi_reduction <add>, %20, %cst_6 [1] : vector<32x512xf32> to vector<32xf32>
    %22 = vector.shape_cast %21 : vector<32xf32> to vector<32x1xf32>
    %23 = math.log %22 : vector<32x1xf32>
    %24 = arith.addf %23, %9 : vector<32x1xf32>
    %cst_7 = arith.constant dense<0.000000e+00> : vector<32xf32>
    %25 = vector.multi_reduction <add>, %0, %cst_7 [1] : vector<32x512xf32> to vector<32xf32>
    %26 = vector.shape_cast %25 : vector<32xf32> to vector<32x1xf32>
    %27 = arith.subf %24, %17 : vector<32x1xf32>
    %cst_8 = arith.constant 5.120000e+02 : f32
    %28 = vector.broadcast %cst_8 : f32 to vector<32x1xf32>
    %29 = arith.mulf %28, %24 : vector<32x1xf32>
    %30 = arith.subf %29, %26 : vector<32x1xf32>
    %c1_i32 = arith.constant 1 : i32
    %31 = vector.broadcast %c1_i32 : i32 to vector<32x1xi32>
    %32 = arith.cmpi ne, %1, %31 : vector<32x1xi32>
    %33 = arith.andi %7, %32 : vector<32x1xi1>
    %cst_9 = arith.constant 0.000000e+00 : f32
    %34 = vector.broadcast %cst_9 : f32 to vector<32x1xf32>
    %35 = arith.select %33, %27, %34 : vector<32x1xi1>, vector<32x1xf32>
    %cst_10 = arith.constant 0.000000e+00 : f32
    %36 = vector.broadcast %cst_10 : f32 to vector<32x1xf32>
    %37 = arith.select %33, %30, %36 : vector<32x1xi1>, vector<32x1xf32>
    %cst_11 = arith.constant 1.000000e+00 : f32
    %cst_12 = arith.constant 0.000000e+00 : f32
    %38 = vector.broadcast %cst_11 : f32 to vector<32x1xf32>
    %39 = vector.broadcast %cst_12 : f32 to vector<32x1xf32>
    %40 = arith.select %33, %38, %39 : vector<32x1xi1>, vector<32x1xf32>
    %41 = vector.shape_cast %40 : vector<32x1xf32> to vector<1x32x1xf32>
    %cst_13 = arith.constant dense<0.000000e+00> : vector<1xf32>
    %42 = vector.multi_reduction <add>, %41, %cst_13 [1, 2] : vector<1x32x1xf32> to vector<1xf32>
    %43 = vector.shape_cast %42 : vector<1xf32> to vector<1x1x1xf32>
    %44 = vector.extract %43[0, 0, 0] : f32 from vector<1x1x1xf32>
    %45 = vector.shape_cast %35 : vector<32x1xf32> to vector<1x32x1xf32>
    %cst_14 = arith.constant dense<0.000000e+00> : vector<1xf32>
    %46 = vector.multi_reduction <add>, %45, %cst_14 [1, 2] : vector<1x32x1xf32> to vector<1xf32>
    %47 = vector.shape_cast %46 : vector<1xf32> to vector<1x1x1xf32>
    %48 = vector.extract %47[0, 0, 0] : f32 from vector<1x1x1xf32>
    %49 = vector.shape_cast %37 : vector<32x1xf32> to vector<1x32x1xf32>
    %cst_15 = arith.constant dense<0.000000e+00> : vector<1xf32>
    %50 = vector.multi_reduction <add>, %49, %cst_15 [1, 2] : vector<1x32x1xf32> to vector<1xf32>
    %51 = vector.shape_cast %50 : vector<1xf32> to vector<1x1x1xf32>
    %52 = vector.extract %51[0, 0, 0] : f32 from vector<1x1x1xf32>
    %53 = tpu.iota {dimensions = array<i32: 2>} : vector<1x8x128xi32>
    %c0_i32 = arith.constant 0 : i32
    %54 = vector.broadcast %c0_i32 : i32 to vector<1x8x128xi32>
    %55 = arith.cmpi eq, %53, %54 : vector<1x8x128xi32>
    %cst_16 = arith.constant 0.000000e+00 : f32
    %56 = vector.broadcast %48 : f32 to vector<1x8x128xf32>
    %57 = vector.broadcast %cst_16 : f32 to vector<1x8x128xf32>
    %58 = arith.select %55, %56, %57 : vector<1x8x128xi1>, vector<1x8x128xf32>
    %c1_i32_17 = arith.constant 1 : i32
    %59 = vector.broadcast %c1_i32_17 : i32 to vector<1x8x128xi32>
    %60 = arith.cmpi eq, %53, %59 : vector<1x8x128xi32>
    %cst_18 = arith.constant 0.000000e+00 : f32
    %61 = vector.broadcast %52 : f32 to vector<1x8x128xf32>
    %62 = vector.broadcast %cst_18 : f32 to vector<1x8x128xf32>
    %63 = arith.select %60, %61, %62 : vector<1x8x128xi1>, vector<1x8x128xf32>
    %64 = arith.addf %58, %63 : vector<1x8x128xf32>
    %c2_i32 = arith.constant 2 : i32
    %65 = vector.broadcast %c2_i32 : i32 to vector<1x8x128xi32>
    %66 = arith.cmpi eq, %53, %65 : vector<1x8x128xi32>
    %cst_19 = arith.constant 0.000000e+00 : f32
    %67 = vector.broadcast %44 : f32 to vector<1x8x128xf32>
    %68 = vector.broadcast %cst_19 : f32 to vector<1x8x128xf32>
    %69 = arith.select %66, %67, %68 : vector<1x8x128xi1>, vector<1x8x128xf32>
    %70 = arith.addf %64, %69 : vector<1x8x128xf32>
    %c0_20 = arith.constant 0 : index
    %c0_21 = arith.constant 0 : index
    %c0_22 = arith.constant 0 : index
    %71 = vector.load %arg3[%c0_20, %c0_21, %c0_22] : memref<1x8x128xf32, #tpu.memory_space<vmem>>, vector<1x8x128xf32>
    tpu.vector_store %arg3[%c0_20, %c0_21, %c0_22], %70 {strides = array<i32>} : memref<1x8x128xf32, #tpu.memory_space<vmem>>, vector<1x8x128xf32>,
    return
  }
  func.func @transform_0(%arg0: i32) -> (i32, i32) {
    %c0_i32 = arith.constant 0 : i32
    %c0_i32_0 = arith.constant 0 : i32
    return %arg0, %c0_i32 : i32, i32
  }
  func.func @transform_1(%arg0: i32) -> (i32, i32) {
    %c0_i32 = arith.constant 0 : i32
    %c0_i32_0 = arith.constant 0 : i32
    return %arg0, %c0_i32 : i32, i32
  }
  func.func @transform_2(%arg0: i32) -> (i32, i32, i32) {
    %c0_i32 = arith.constant 0 : i32
    %c0_i32_0 = arith.constant 0 : i32
    %c0_i32_1 = arith.constant 0 : i32
    return %arg0, %c0_i32, %c0_i32_0 : i32, i32, i32
  }
}

</mosaic_0001>

<bundles_post_ra>
// kernel: tpu_custom_call.1
= control target key start
LH: loop header
LB: loop body
LE: loop exit
PB: predicated region body
PF: predicated region fallthrough
CT: control target
= control target key end

     0   :  { %7 = vsyncpa [#allocation3], 0  ;;  %s714_s0 = inlined_call_operand.hbm [shape: f32[32,512], index: 0, kind: input, shape index: {}]   ;;  %s715_s1 = inlined_call_operand.vmem [shape: s32[32,1], index: 1, kind: input, shape index: {}]   ;;  %s716_s2 = inlined_call_operand.hbm [shape: f32[1,8,128], index: 2, kind: output, shape index: {}]  }
   0x1   :  { %8 = vsyncpa [#allocation4], 0  ;;  %s13_s11 = sshll.u32 %s714_s0, 4  ;;  %s469_s12 = smov [#allocation2]   ;;  %s14_s11 = int_to_ptr.hbm [resolvable:$true] %s13_s11 }
   0x2   :  { %s15_s13 = sshll.u32 %s469_s12, 4  ;;  %s470_s14 = smov 512   ;;  %s16_s13 = int_to_ptr.vmem [resolvable:$true] %s15_s13 }
   0x3   :  { %s471_s15 = smov 32  }
   0x4   :  { %21 = dma.hbm_to_vmem [thread:$0]  %s14_s11, 2048, %s16_s13, [#allocation3], %s470_s14, %s470_s14, %s471_s15  }
   0x5   :  { %465 = dma.done.wait [#allocation3], 2048  }
   0x6   :  { %466 = vsyncadd [#allocation3], 4294965248  ;;  %v472_v0 = vmov 0   ;;  %v493_v1 = vld [vmem:[#allocation2 + $0x40] sm:$0xff]  ;;  %v495_v2 = vld [vmem:[#allocation2 + $0x48] sm:$0xff]  ;;  %v83_v38 = vlaneseq  ;;  %s474_s25 = smov [#allocation5]  }
   0x7   :  { %374 = vset.pattern.permute.xlu2 %v472_v0  ;;  %375 = vset.pattern.permute.xlu0 %v472_v0  ;;  %v497_v3 = vld [vmem:[#allocation2 + $0x50] sm:$0xff]  ;;  %v73_v4 = vmax.f32 %v493_v1, %v495_v2  ;;  %v501_v5 = vld [vmem:[#allocation2] sm:$0xff]  ;;  %v503_v6 = vld [vmem:[#allocation2 + $0x8] sm:$0xff]  ;;  %s350_s26 = sshll.u32 %s474_s25, 4  ;;  %s352_s29 = sshll.u32 %s716_s2, 4  ;;  %s351_s26 = int_to_ptr.vmem [resolvable:$true] %s350_s26  ;;  %s353_s29 = int_to_ptr.hbm [resolvable:$true] %s352_s29 }
   0x8   :  { %376 = vset.pattern.permute.xlu1 %v472_v0  ;;  %v505_v7 = vld [vmem:[#allocation2 + $0x58] sm:$0xff]  ;;  %v507_v8 = vld [vmem:[#allocation2 + $0x10] sm:$0xff]  ;;  %v63_v9 = vmax.f32 %v501_v5, %v503_v6  ;;  %v511_v10 = vld [vmem:[#allocation2 + $0x20] sm:$0xff]  ;;  %v585_v49 = vand.u32 127, %v83_v38 }
   0x9   :  { %v74_v11 = vmax.f32 %v73_v4, %v497_v3  ;;  %v514_v12 = vld [vmem:[#allocation2 + $0x18] sm:$0xff]  ;;  %v516_v13 = vld [vmem:[#allocation2 + $0x28] sm:$0xff]  ;;  %v521_v16 = vld [vmem:[#allocation2 + $0x60] sm:$0xff] }
   0xa   :  { %v64_v14 = vmax.f32 %v63_v9, %v507_v8  ;;  %v68_v15 = vmax.f32 %v511_v10, %v516_v13  ;;  %v523_v17 = vld [vmem:[#allocation2 + $0x68] sm:$0xff]  ;;  %v525_v18 = vld [vmem:[#allocation2 + $0x70] sm:$0xff]  ;;  %v535_v22 = vld [vmem:[%s715_s1] sm:$0xff]  ;;  %v588_v52 = vadd.s32 128, %v585_v49 }
   0xb   :  { %v75_v19 = vmax.f32 %v74_v11, %v505_v7  ;;  %v528_v20 = vld [vmem:[#allocation2 + $0x30] sm:$0xff]  ;;  %v78_v21 = vmax.f32 %v521_v16, %v523_v17  ;;  %89 = vperm.xlu2 %374, %v535_v22   ;;  %v541_v26 = vld [vmem:[#allocation2 + $0x78] sm:$0xff]  ;;  %v549_v29 = vld [vmem:[%s715_s1 + $0x8] sm:$0xff] }
   0xc   :  { %v65_v23 = vmax.f32 %v64_v14, %v514_v12  ;;  %v69_v25 = vmax.f32 %v68_v15, %v528_v20  ;;  %v543_v27 = vld [vmem:[#allocation2 + $0x38] sm:$0xff]  ;;  %v556_v31 = vld [vmem:[%s715_s1 + $0x10] sm:$0xff]  ;;  %v603_v15 = vadd.s32 256, %v585_v49 }
   0xd   :  { %76 = vmax.xlane.f32.xlu1 %v75_v19  ;;  %v79_v24 = vmax.f32 %v78_v21, %v525_v18  ;;  %v562_v32 = vld [vmem:[%s715_s1 + $0x18] sm:$0xff] }
   0xe   :  { %66 = vmax.xlane.f32.xlu0 %v65_v23  ;;  %v70_v30 = vmax.f32 %v69_v25, %v543_v27 }
   0xf   :  { %v80_v28 = vmax.f32 %v79_v24, %v541_v26 }
  0x13   :  { %92 = vperm.xlu2 %374, %v549_v29  }
  0x15   :  { %81 = vmax.xlane.f32.xlu1 %v80_v28 }
  0x16   :  { %71 = vmax.xlane.f32.xlu0 %v70_v30 }
  0x2a   :  { %95 = vperm.xlu0 %375, %v556_v31  }
  0x2e   :  { %98 = vperm.xlu1 %376, %v562_v32  }
  0x65   :  { %v90_v53 = vpop.permute.xlu2 %89 }
  0x66   :  { %vm100_vm0 = vcmp.eq.s32.totalorder %v585_v49, %v90_v53  ;;  %vm101_vm1 = vcmp.eq.s32.totalorder %v588_v52, %v90_v53  ;;  %vm102_vm2 = vcmp.eq.s32.totalorder %v603_v15, %v90_v53 }
  0x67   :  { %v116_v28 = vsel %vm100_vm0, %v501_v5, 0.0  ;;  %v117_v30 = vsel %vm101_vm1, %v503_v6, 0.0  ;;  %vm264_vm0 = vcmp.ne.s32.totalorder %v535_v22, 1  ;;  %vm265_vm1 = vcmp.ne.s32.totalorder %v549_v29, 1 }
  0x80   :  { %v565_v33 = vpop.xlane.xlu1 %76 }
  0x81   :  { %v160_v34 = vsub.f32 %v493_v1, %v565_v33  ;;  %v161_v35 = vsub.f32 %v495_v2, %v565_v33  ;;  %v162_v36 = vsub.f32 %v497_v3, %v565_v33  ;;  %v573_v37 = vpop.xlane.xlu0 %66  ;;  %v163_v42 = vsub.f32 %v505_v7, %v565_v33 }
  0x82   :  { %v152_v39 = vsub.f32 %v501_v5, %v573_v37  ;;  %v153_v40 = vsub.f32 %v503_v6, %v573_v37  ;;  %v154_v41 = vsub.f32 %v507_v8, %v573_v37  ;;  %v155_v47 = vsub.f32 %v514_v12, %v573_v37 }
  0x83   :  { %v184_v43 = vmul.f32 1.442695, %v160_v34  ;;  %v186_v44 = vmul.f32 1.442695, %v161_v35  ;;  %v188_v45 = vmul.f32 1.442695, %v162_v36 }
  0x84   :  { %v168_v46 = vmul.f32 1.442695, %v152_v39  ;;  %v170_v48 = vmul.f32 1.442695, %v153_v40  ;;  %v172_v50 = vmul.f32 1.442695, %v154_v41  ;;  %v93_v39 = vpop.permute.xlu2 %92 }
  0x85   :  { %377 = vpow2.f32 %v184_v43  ;;  %v190_v51 = vmul.f32 1.442695, %v163_v42  ;;  %v174_v55 = vmul.f32 1.442695, %v155_v47  ;;  %v608_v36 = vadd.s32 384, %v585_v49 }
  0x86   :  { %379 = vpow2.f32 %v186_v44  ;;  %v132_v42 = vadd.f32 %v117_v30, %v116_v28  ;;  %v118_v44 = vsel %vm102_vm2, %v507_v8, 0.0  ;;  %vm104_vm3 = vcmp.eq.s32.totalorder %v585_v49, %v93_v39 }
  0x87   :  { %381 = vpow2.f32 %v188_v45  ;;  %vm105_vm4 = vcmp.eq.s32.totalorder %v588_v52, %v93_v39  ;;  %vm103_vm5 = vcmp.eq.s32.totalorder %v608_v36, %v90_v53  ;;  %vm106_vm6 = vcmp.eq.s32.totalorder %v603_v15, %v93_v39 }
  0x88   :  { %383 = vpow2.f32 %v168_v46  ;;  %vm107_vm7 = vcmp.eq.s32.totalorder %v608_v36, %v93_v39  ;;  %vm284_vm2 = vcmask 7168  }
  0x89   :  { %385 = vpow2.f32 %v170_v48  ;;  %v590_v54 = vpop.xlane.xlu0 %71  ;;  %v615_v48 = vpop.xlane.xlu1 %81 }
  0x8a   :  { %387 = vpow2.f32 %v172_v50  ;;  %v156_v56 = vsub.f32 %v511_v10, %v590_v54  ;;  %v157_v57 = vsub.f32 %v516_v13, %v590_v54  ;;  %v158_v58 = vsub.f32 %v528_v20, %v590_v54 }
  0x8b   :  { %v378_v59 = vpop.eup %377  ;;  %v159_v60 = vsub.f32 %v543_v27, %v590_v54  ;;  %389 = vpow2.f32 %v190_v51  ;;  %v133_v50 = vadd.f32 %v132_v42, %v118_v44  ;;  %v165_v53 = vsub.f32 %v523_v17, %v615_v48 }
  0x8c   :  { %v380_v61 = vpop.eup %379  ;;  %v176_v62 = vmul.f32 1.442695, %v156_v56  ;;  %v178_v63 = vmul.f32 1.442695, %v157_v57  ;;  %v180_v0 = vmul.f32 1.442695, %v158_v58  ;;  %391 = vpow2.f32 %v174_v55 }
  0x8d   :  { %v382_v4 = vpop.eup %381  ;;  %v210_v9 = vadd.f32 %v380_v61, %v378_v59  ;;  %v182_v11 = vmul.f32 1.442695, %v159_v60  ;;  %v237_v55 = vadd.f32 %v516_v13, %v511_v10  ;;  %v119_v56 = vsel %vm103_vm5, %v514_v12, 0.0 }
  0x8e   :  { %v384_v14 = vpop.eup %383  ;;  %393 = vpow2.f32 %v176_v62  ;;  %v120_v57 = vsel %vm104_vm3, %v511_v10, 0.0  ;;  %v121_v58 = vsel %vm105_vm4, %v516_v13, 0.0  ;;  %v164_v60 = vsub.f32 %v521_v16, %v615_v48 }
  0x8f   :  { %v386_v19 = vpop.eup %385  ;;  %395 = vpow2.f32 %v178_v63  ;;  %v211_v21 = vadd.f32 %v382_v4, %v210_v9  ;;  %v134_v61 = vadd.f32 %v133_v50, %v119_v56  ;;  %v137_v62 = vadd.f32 %v121_v58, %v120_v57 }
  0x90   :  { %v388_v23 = vpop.eup %387  ;;  %397 = vpow2.f32 %v180_v0  ;;  %v200_v24 = vadd.f32 %v386_v19, %v384_v14  ;;  %v238_v63 = vadd.f32 %v237_v55, %v528_v20  ;;  %v122_v0 = vsel %vm106_vm6, %v528_v20, 0.0 }
  0x91   :  { %v390_v25 = vpop.eup %389  ;;  %399 = vpow2.f32 %v182_v11  ;;  %v192_v10 = vmul.f32 1.442695, %v164_v60  ;;  %v166_v13 = vsub.f32 %v525_v18, %v615_v48  ;;  %v194_v4 = vmul.f32 1.442695, %v165_v53 }
  0x92   :  { %v212_v34 = vadd.f32 %v390_v25, %v211_v21  ;;  %v201_v35 = vadd.f32 %v388_v23, %v200_v24  ;;  %v392_v38 = vpop.eup %391  ;;  %v247_v9 = vadd.f32 %v523_v17, %v521_v16  ;;  %v138_v11 = vadd.f32 %v137_v62, %v122_v0 }
  0x93   :  { %v239_v14 = vadd.f32 %v238_v63, %v543_v27  ;;  %v242_v19 = vadd.f32 %v495_v2, %v493_v1  ;;  %v123_v21 = vsel %vm107_vm7, %v543_v27, 0.0  ;;  %401 = vpow2.f32 %v192_v10 }
  0x94   :  { %v394_v40 = vpop.eup %393  ;;  %213 = vadd.xlane.f32.xlu0 %v212_v34  ;;  %v202_v41 = vadd.f32 %v392_v38, %v201_v35  ;;  %v248_v20 = vadd.f32 %v247_v9, %v525_v18  ;;  %v232_v23 = vadd.f32 %v503_v6, %v501_v5  ;;  %v167_v24 = vsub.f32 %v541_v26, %v615_v48 }
  0x95   :  { %v396_v43 = vpop.eup %395  ;;  %403 = vpow2.f32 %v194_v4  ;;  %v196_v25 = vmul.f32 1.442695, %v166_v13  ;;  %v139_v30 = vadd.f32 %v138_v11, %v123_v21  ;;  %v243_v34 = vadd.f32 %v242_v19, %v497_v3 }
  0x96   :  { %v398_v45 = vpop.eup %397  ;;  %203 = vadd.xlane.f32.xlu2 %v202_v41  ;;  %v205_v46 = vadd.f32 %v396_v43, %v394_v40  ;;  %v249_v28 = vadd.f32 %v248_v20, %v541_v26  ;;  %v233_v27 = vadd.f32 %v232_v23, %v507_v8  ;;  %v198_v35 = vmul.f32 1.442695, %v167_v24 }
  0x97   :  { %v400_v47 = vpop.eup %399  ;;  %405 = vpow2.f32 %v196_v25  ;;  %v244_v5 = vadd.f32 %v243_v34, %v505_v7  ;;  %vm266_vm3 = vcmp.ne.s32.totalorder %v556_v31, 1  ;;  %vm267_vm4 = vcmp.ne.s32.totalorder %v562_v32, 1 }
  0x98   :  { %v206_v51 = vadd.f32 %v398_v45, %v205_v46  ;;  %v234_v39 = vadd.f32 %v233_v27, %v514_v12  ;;  %407 = vpow2.f32 %v198_v35  ;;  %vm333_vm5 = vcmp.eq.s32.totalorder %v585_v49, 0 }
  0x99   :  { %v402_v38 = vpop.eup %401  ;;  %vm336_vm6 = vcmp.eq.s32.totalorder %v585_v49, 1  ;;  %vm340_vm7 = vcmp.eq.s32.totalorder %v585_v49, 2 }
  0x9a   :  { %v207_v59 = vadd.f32 %v400_v47, %v206_v51 }
  0x9b   :  { %v404_v6 = vpop.eup %403 }
  0x9c   :  { %208 = vadd.xlane.f32.xlu1 %v207_v59  ;;  %250 = vadd.xlane.f32.xlu0 %v249_v28  ;;  %v96_v40 = vpop.permute.xlu0 %95  ;;  %v215_v41 = vadd.f32 %v404_v6, %v402_v38 }
  0x9d   :  { %v406_v42 = vpop.eup %405  ;;  %vm108_vm8 = vcmp.eq.s32.totalorder %v585_v49, %v96_v40  ;;  %vm109_vm9 = vcmp.eq.s32.totalorder %v588_v52, %v96_v40  ;;  %vm110_vm10 = vcmp.eq.s32.totalorder %v603_v15, %v96_v40  ;;  %vm111_vm13 = vcmp.eq.s32.totalorder %v608_v36, %v96_v40 }
  0x9e   :  { %135 = vadd.xlane.f32.xlu2 %v134_v61  ;;  %v216_v43 = vadd.f32 %v406_v42, %v215_v41  ;;  %v408_v8 = vpop.eup %407  ;;  %v124_v44 = vsel %vm108_vm8, %v493_v1, 0.0  ;;  %v125_v45 = vsel %vm109_vm9, %v495_v2, 0.0  ;;  %v126_v50 = vsel %vm110_vm10, %v497_v3, 0.0 }
  0x9f   :  { %v142_v47 = vadd.f32 %v125_v45, %v124_v44  ;;  %v127_v55 = vsel %vm111_vm13, %v505_v7, 0.0 }
  0xa0   :  { %v99_v46 = vpop.permute.xlu1 %98  ;;  %v217_v12 = vadd.f32 %v408_v8, %v216_v43 }
  0xa1   :  { %vm112_vm11 = vcmp.eq.s32.totalorder %v585_v49, %v99_v46  ;;  %vm113_vm12 = vcmp.eq.s32.totalorder %v588_v52, %v99_v46  ;;  %v143_v51 = vadd.f32 %v142_v47, %v126_v50  ;;  %vm114_vm14 = vcmp.eq.s32.totalorder %v603_v15, %v99_v46 }
  0xa2   :  { %v128_v1 = vsel %vm112_vm11, %v521_v16, 0.0  ;;  %v129_v2 = vsel %vm113_vm12, %v523_v17, 0.0  ;;  %v130_v3 = vsel %vm114_vm14, %v525_v18, 0.0  ;;  %vm115_vm15 = vcmp.eq.s32.totalorder %v608_v36, %v99_v46 }
  0xa3   :  { %v144_v56 = vadd.f32 %v143_v51, %v127_v55  ;;  %v147_v57 = vadd.f32 %v129_v2, %v128_v1  ;;  %v131_v52 = vsel %vm115_vm15, %v541_v26, 0.0  ;;  %v473_v18 = vmov 0.0  }
  0xa4   :  { %240 = vadd.xlane.f32.xlu1 %v239_v14  ;;  %v280_v15 = vsel %vm264_vm0, 1.0, %v473_v18  ;;  %v281_v26 = vsel %vm265_vm1, 1.0, %v473_v18  ;;  %v282_v10 = vsel %vm266_vm3, 1.0, %v473_v18  ;;  %v283_v23 = vsel %vm267_vm4, 1.0, %v473_v18 }
  0xa5   :  { %v148_v58 = vadd.f32 %v147_v57, %v130_v3  ;;  %v285_v63 = vsel %vm284_vm2, %v280_v15, 0.0  ;;  %v286_v0 = vsel %vm284_vm2, %v281_v26, 0.0  ;;  %v288_v21 = vsel %vm284_vm2, %v282_v10, 0.0 }
  0xa6   :  { %140 = vadd.xlane.f32.xlu2 %v139_v30  ;;  %v287_v19 = vadd.f32 %v286_v0, %v285_v63  ;;  %v290_v28 = vsel %vm284_vm2, %v283_v23, 0.0 }
  0xa7   :  { %v149_v59 = vadd.f32 %v148_v58, %v131_v52 }
  0xa8   :  { %v289_v24 = vadd.f32 %v288_v21, %v287_v19 }
  0xaa   :  { %v291_v35 = vadd.f32 %v290_v28, %v289_v24 }
  0xac   :  { %245 = vadd.xlane.f32.xlu1 %v244_v5 }
  0xae   :  { %235 = vadd.xlane.f32.xlu2 %v234_v39 }
  0xb4   :  { %292 = vadd.xlane.f32.xlu1 %v291_v35 }
  0xb6   :  { %218 = vadd.xlane.f32.xlu2 %v217_v12 }
  0xbe   :  { %145 = vadd.xlane.f32.xlu2 %v144_v56 }
  0xc6   :  { %150 = vadd.xlane.f32.xlu2 %v149_v59 }
 0x107   :  { %v214_v7 = vpop.xlane.xlu0 %213 }
 0x109   :  { %v204_v60 = vpop.xlane.xlu2 %203 }
 0x10a   :  { %409 = vlog2.f32 %v204_v60 }
 0x10b   :  { %411 = vlog2.f32 %v214_v7 }
 0x10f   :  { %v209_v16 = vpop.xlane.xlu1 %208  ;;  %v251_v58 = vpop.xlane.xlu0 %250 }
 0x110   :  { %v410_v17 = vpop.eup %409  ;;  %413 = vlog2.f32 %v209_v16 }
 0x111   :  { %v221_v36 = vmul.f32 0.6931472, %v410_v17  ;;  %v136_v53 = vpop.xlane.xlu2 %135  ;;  %v412_v61 = vpop.eup %411 }
 0x112   :  { %v225_v4 = vmul.f32 0.6931472, %v412_v61 }
 0x113   :  { %v228_v62 = vadd.f32 %v221_v36, %v573_v37 }
 0x114   :  { %v230_v25 = vadd.f32 %v225_v4, %v565_v33 }
 0x115   :  { %v252_v9 = vsub.f32 %v228_v62, %v136_v53  ;;  %v256_v41 = vmul.f32 512.0, %v228_v62 }
 0x116   :  { %v414_v13 = vpop.eup %413  ;;  %v258_v39 = vmul.f32 512.0, %v230_v25 }
 0x117   :  { %v223_v11 = vmul.f32 0.6931472, %v414_v13  ;;  %v241_v14 = vpop.xlane.xlu1 %240  ;;  %v272_v30 = vsel %vm264_vm0, %v252_v9, 0.0 }
 0x119   :  { %v141_v37 = vpop.xlane.xlu2 %140  ;;  %v229_v20 = vadd.f32 %v223_v11, %v590_v54  ;;  %v301_v54 = vsel %vm284_vm2, %v272_v30, 0.0 }
 0x11b   :  { %v253_v34 = vsub.f32 %v229_v20, %v141_v37  ;;  %v257_v27 = vmul.f32 512.0, %v229_v20 }
 0x11d   :  { %v273_v38 = vsel %vm265_vm1, %v253_v34, 0.0  ;;  %v261_v6 = vsub.f32 %v257_v27, %v241_v14 }
 0x11e   :  { %v302_v5 = vsel %vm284_vm2, %v273_v38, 0.0 }
 0x11f   :  { %v303_v40 = vadd.f32 %v302_v5, %v301_v54  ;;  %v246_v33 = vpop.xlane.xlu1 %245  ;;  %v277_v8 = vsel %vm265_vm1, %v261_v6, 0.0 }
 0x120   :  { %v262_v42 = vsub.f32 %v258_v39, %v246_v33  ;;  %v318_v12 = vsel %vm284_vm2, %v277_v8, 0.0 }
 0x121   :  { %v236_v43 = vpop.xlane.xlu2 %235 }
 0x122   :  { %v260_v44 = vsub.f32 %v256_v41, %v236_v43  ;;  %v278_v46 = vsel %vm266_vm3, %v262_v42, 0.0 }
 0x123   :  { %v320_v51 = vsel %vm284_vm2, %v278_v46, 0.0 }
 0x124   :  { %v276_v45 = vsel %vm264_vm0, %v260_v44, 0.0 }
 0x125   :  { %v317_v47 = vsel %vm284_vm2, %v276_v45, 0.0 }
 0x126   :  { %v319_v50 = vadd.f32 %v318_v12, %v317_v47 }
 0x127   :  { %v293_v53 = vpop.xlane.xlu1 %292 }
 0x128   :  { %v321_v55 = vadd.f32 %v320_v51, %v319_v50  ;;  %v294_v61 = vrot.slane %v293_v53, 4 }
 0x129   :  { %v219_v1 = vpop.xlane.xlu2 %218 }
 0x12a   :  { %415 = vlog2.f32 %v219_v1  ;;  %v295_v62 = vadd.f32 %v294_v61, %v293_v53 }
 0x12c   :  { %v296_v63 = vrot.slane %v295_v62, 2 }
 0x12e   :  { %v297_v0 = vadd.f32 %v296_v63, %v295_v62 }
 0x130   :  { %v416_v2 = vpop.eup %415  ;;  %v298_v10 = vrot.slane %v297_v0, 1 }
 0x131   :  { %v227_v29 = vmul.f32 0.6931472, %v416_v2  ;;  %v146_v56 = vpop.xlane.xlu2 %145 }
 0x132   :  { %v254_v57 = vsub.f32 %v230_v25, %v146_v56  ;;  %v299_v13 = vadd.f32 %v298_v10, %v297_v0 }
 0x133   :  { %v231_v22 = vadd.f32 %v227_v29, %v615_v48 }
 0x134   :  { %v274_v3 = vsel %vm266_vm3, %v254_v57, 0.0  ;;  %362 = vpush %v299_v13 }
 0x135   :  { %v304_v52 = vsel %vm284_vm2, %v274_v3, 0.0  ;;  %v259_v59 = vmul.f32 512.0, %v231_v22 }
 0x136   :  { %v305_v60 = vadd.f32 %v304_v52, %v303_v40 }
 0x137   :  { %v263_v7 = vsub.f32 %v259_v59, %v251_v58 }
 0x139   :  { %v279_v16 = vsel %vm267_vm4, %v263_v7, 0.0  ;;  %v151_v17 = vpop.xlane.xlu2 %150 }
 0x13a   :  { %v255_v18 = vsub.f32 %v231_v22, %v151_v17  ;;  %v322_v15 = vsel %vm284_vm2, %v279_v16, 0.0 }
 0x13b   :  { %v323_v26 = vadd.f32 %v322_v15, %v321_v55 }
 0x13c   :  { %v275_v48 = vsel %vm267_vm4, %v255_v18, 0.0 }
 0x13d   :  { %324 = vadd.xlane.f32.xlu0 %v323_v26  ;;  %v306_v31 = vsel %vm284_vm2, %v275_v48, 0.0 }
 0x13e   :  { %v307_v36 = vadd.f32 %v306_v31, %v305_v60 }
 0x140   :  { %308 = vadd.xlane.f32.xlu2 %v307_v36 }
 0x165   :  { %s363_s1 = spop %362 }
 0x166   :  { %v341_v27 = vstv %s363_s1 }
 0x167   :  { %v342_v6 = vsel %vm340_vm7, %v341_v27, 0.0 }
 0x1b0   :  { %v325_v4 = vpop.xlane.xlu0 %324 }
 0x1b1   :  { %v326_v9 = vrot.slane %v325_v4, 4 }
 0x1b3   :  { %v327_v11 = vadd.f32 %v326_v9, %v325_v4  ;;  %v309_v14 = vpop.xlane.xlu2 %308 }
 0x1b4   :  { %v310_v19 = vrot.slane %v309_v14, 4 }
 0x1b5   :  { %v328_v32 = vrot.slane %v327_v11, 2 }
 0x1b6   :  { %v311_v21 = vadd.f32 %v310_v19, %v309_v14 }
 0x1b7   :  { %v329_v37 = vadd.f32 %v328_v32, %v327_v11 }
 0x1b8   :  { %v312_v20 = vrot.slane %v311_v21, 2 }
 0x1b9   :  { %v330_v24 = vrot.slane %v329_v37, 1 }
 0x1ba   :  { %v313_v23 = vadd.f32 %v312_v20, %v311_v21 }
 0x1bb   :  { %v331_v30 = vadd.f32 %v330_v24, %v329_v37 }
 0x1bc   :  { %v314_v25 = vrot.slane %v313_v23, 1 }
 0x1be   :  { %v315_v28 = vadd.f32 %v314_v25, %v313_v23 }
 0x1c0   :  { %364 = vpush %v315_v28 }
 0x1c1   :  { %366 = vpush %v331_v30 }
 0x1f1   :  { %s365_s23 = spop %364 }
 0x1f2   :  { %v334_v34 = vstv %s365_s23  ;;  %s367_s24 = spop %366 }
 0x1f3   :  { %v335_v35 = vsel %vm333_vm5, %v334_v34, 0.0  ;;  %v337_v38 = vstv %s367_s24 }
 0x1f4   :  { %v338_v54 = vsel %vm336_vm6, %v337_v38, 0.0 }
 0x1f5   :  { %v339_v5 = vadd.f32 %v338_v54, %v335_v35 }
 0x1f7   :  { %v343_v39 = vadd.f32 %v342_v6, %v339_v5 }
 0x1f9   :  { %344 = vst [vmem:[#allocation5] sm:$0xff] %v343_v39 }
 0x1fa   :  { %355 = dma.vmem_to_hbm [thread:$0]  %s351_s26, 128, %s353_s29, [#allocation4]  }
 0x1fb   :  { %467 = dma.done.wait [#allocation4], 128  }
 0x1fc   :  { %468 = vsyncadd [#allocation4], 4294967168 }
 0x1fd   :  { %360 = vsyncpa [#allocation3], 1 }
 0x1fe   :  { %361 = vsyncpa [#allocation4], 1 }

</bundles_post_ra>
